<compile_context>
chip_gen: v7x
topology: tpu7x:2x2x1
jax: 0.10.0
libtpu: 0.0.40
codegen_flags: <defaults>
</compile_context>

<pallas_src>
import jax
import jax.numpy as jnp
from jax.experimental import pallas as pl
from jax.experimental.pallas import tpu as pltpu


def _round_up(x, m):
    return (x + m - 1) // m * m


def lspe_head_kernel(ids_ref, h_ref, p_ref, w_ref, b_ref, out_ref):
    # ids_ref : [TILE_N, 1]    int32  graph id per node (== num_graphs on pad rows)
    # h_ref   : [TILE_N, H]    f32
    # p_ref   : [TILE_N, H]    f32
    # w_ref   : [2, H]         f32    lane-major weight rows [w_h; w_p]
    # b_ref   : [1, 1]         f32    (SMEM scalar)
    # out_ref : [1, 1, G_pad]  f32    resident per-split accumulator (lane-dense)
    k = pl.program_id(1)

    @pl.when(k == 0)
    def _init():
        out_ref[...] = jnp.zeros_like(out_ref)

    # Per-node linear projection on the VPU (sublane-broadcast mul) + XLU lane reduce.
    w_h = w_ref[0:1, :]                                   # [1, H]
    w_p = w_ref[1:2, :]                                   # [1, H]
    scores = jnp.sum(h_ref[...] * w_h + p_ref[...] * w_p,
                     axis=-1, keepdims=True)              # [TILE_N, 1]

    # Segment (per-graph) scatter-add: select score into the matching lane,
    # then sublane-reduce over the node tile. Pad rows (id == num_graphs) only
    # ever land in a padded output column (or match nothing) and are discarded.
    tile_n = ids_ref.shape[0]
    g_pad = out_ref.shape[-1]
    lane_ids = jax.lax.broadcasted_iota(jnp.int32, (tile_n, g_pad), 1)
    masked = jnp.where(lane_ids == ids_ref[...], scores, jnp.float32(0.0))
    partial = jnp.sum(masked, axis=0, keepdims=True)      # [1, G_pad]
    out_ref[...] += partial.reshape(1, 1, g_pad)

    # Add the bias exactly once (first split, last reduction step).
    @pl.when((pl.program_id(0) == 0) & (k == pl.num_programs(1) - 1))
    def _bias():
        out_ref[...] += b_ref[0, 0]


def lspe_mpgnn_head(h, p, h_batch, weight, bias, num_graphs,
                    *, tile_n=1024, num_splits=2):
    """h: [N,H], p: [N,H], h_batch: [N] int, weight: [1,2H], bias: [1] -> [num_graphs] f32."""
    N, H = h.shape

    # Node-tile sizing:
    #  - cap so (2 streamed inputs) x (2 pipeline buffers) x tile stays well
    #    below the scoped-VMEM default (conservative 8 MiB budget),
    #  - shrink for tiny inputs so we don't over-pad,
    #  - keep a multiple of 8 (sublane).
    bytes_per_row = 4 * H
    tile_cap = max(8, ((8 * 1024 * 1024) // (4 * bytes_per_row)) // 8 * 8)
    tile_n = int(min(tile_n, tile_cap, max(8, _round_up(-(-N // num_splits), 8))))
    tiles_per_split = -(-N // (tile_n * num_splits))
    n_pad = tiles_per_split * num_splits * tile_n
    g_pad = _round_up(max(num_graphs, 1), 128)

    h32 = jnp.pad(h.astype(jnp.float32), ((0, n_pad - N), (0, 0)))
    p32 = jnp.pad(p.astype(jnp.float32), ((0, n_pad - N), (0, 0)))
    # Pad rows get graph id == num_graphs: they only match a padded (discarded)
    # output column, never a real graph (segment_sum drop semantics).
    ids = jnp.pad(h_batch.astype(jnp.int32), (0, n_pad - N),
                  constant_values=num_graphs).reshape(n_pad, 1)
    w2 = weight.reshape(2, H).astype(jnp.float32)          # lane-major [w_h; w_p]
    b2 = bias.reshape(1, 1).astype(jnp.float32)

    def node_map(s, k):
        return (s * tiles_per_split + k, 0)

    partials = pl.pallas_call(
        lspe_head_kernel,
        out_shape=jax.ShapeDtypeStruct((num_splits, 1, g_pad), jnp.float32),
        grid=(num_splits, tiles_per_split),
        in_specs=[
            pl.BlockSpec((tile_n, 1), node_map),                 # ids
            pl.BlockSpec((tile_n, H), node_map),                 # h
            pl.BlockSpec((tile_n, H), node_map),                 # p
            pl.BlockSpec((2, H), lambda s, k: (0, 0)),           # weight (lane-major)
            pl.BlockSpec(memory_space=pltpu.MemorySpace.SMEM),   # bias scalar
        ],
        out_specs=pl.BlockSpec((1, 1, g_pad), lambda s, k: (s, 0, 0)),
        compiler_params=pltpu.CompilerParams(
            dimension_semantics=("parallel", "arbitrary")),
    )(ids, h32, p32, w2, b2)

    # Combine per-core partial sums (bias was added exactly once, on split 0)
    # and drop lane padding.
    return partials.sum(axis=0)[0, :num_graphs]


def reference(h, p, h_batch, weight, bias, num_graphs):
    pooled_h = jax.ops.segment_sum(h, h_batch, num_segments=num_graphs)
    pooled_p = jax.ops.segment_sum(p, h_batch, num_segments=num_graphs)
    reprs = jnp.concatenate([pooled_h, pooled_p], axis=1)
    return (reprs @ weight.reshape(1, -1).T + bias).squeeze(1)


if __name__ == "__main__":
    num_hidden = 32
    num_nodes = 16
    num_graphs = 4

    key = jax.random.PRNGKey(0)
    k_h, k_p, k_w, k_b = jax.random.split(key, 4)

    h = jax.random.normal(k_h, (num_nodes, num_hidden), dtype=jnp.float32)
    p = jax.random.normal(k_p, (num_nodes, num_hidden), dtype=jnp.float32)
    # graph assignment: 4 nodes per graph
    h_batch = jnp.repeat(jnp.arange(num_graphs, dtype=jnp.int32),
                         num_nodes // num_graphs)

    # nn.Linear(2*num_hidden, 1): weight [1, 2H], bias [1]
    weight = jax.random.normal(k_w, (1, 2 * num_hidden), dtype=jnp.float32) * 0.1
    bias = jax.random.normal(k_b, (1,), dtype=jnp.float32) * 0.1

    out = lspe_mpgnn_head(h, p, h_batch, weight, bias, num_graphs)
    out = jax.block_until_ready(out)

    ref = reference(h, p, h_batch, weight, bias, num_graphs)
    assert out.shape == (num_graphs,)
    assert jnp.allclose(out, ref, atol=1e-4, rtol=1e-4), (out, ref)

    print("KERNEL_OK")
</pallas_src>

<mosaic_0001>
module attributes {stable_mosaic.version = 11 : i64} {
  func.func @lspe_head_kernel(%arg0: i32, %arg1: i32, %arg2: memref<8x1xi32, #tpu.memory_space<vmem>>, %arg3: memref<8x32xf32, #tpu.memory_space<vmem>>, %arg4: memref<8x32xf32, #tpu.memory_space<vmem>>, %arg5: memref<2x32xf32, #tpu.memory_space<vmem>>, %arg6: memref<1x1xf32, #tpu.memory_space<smem>>, %arg7: memref<1x1x128xf32, #tpu.memory_space<vmem>>) attributes {dimension_semantics = [#tpu.dimension_semantics<parallel>, #tpu.dimension_semantics<arbitrary>], iteration_bounds = array<i64: 2, 1>, scalar_prefetch = 0 : i64, scratch_operands = 0 : i64, tpu.core_type = #tpu.core_type<tc>, window_params = [{transform_indices = @transform_0, window_bounds = array<i64: 8, 1>}, {transform_indices = @transform_1, window_bounds = array<i64: 8, 32>}, {transform_indices = @transform_2, window_bounds = array<i64: 8, 32>}, {pipeline_mode = #tpu.pipeline_mode<synchronous>, transform_indices = @transform_3, window_bounds = array<i64: 2, 32>}, {transform_indices = @transform_4, window_bounds = array<i64: 1, 1>}, {transform_indices = @transform_5, window_bounds = array<i64: 1, 1, 128>}]} {
    %c0_i32 = arith.constant 0 : i32
    %0 = arith.cmpi eq, %arg1, %c0_i32 : i32
    %1 = arith.extui %0 : i1 to i32
    %c0_i32_0 = arith.constant 0 : i32
    %2 = arith.cmpi ne, %1, %c0_i32_0 : i32
    scf.if %2 {
      %cst_20 = arith.constant 0.000000e+00 : f32
      %33 = vector.broadcast %cst_20 : f32 to vector<1x1x128xf32>
      %c0_21 = arith.constant 0 : index
      %c0_22 = arith.constant 0 : index
      %c0_23 = arith.constant 0 : index
      %34 = vector.load %arg7[%c0_21, %c0_22, %c0_23] : memref<1x1x128xf32, #tpu.memory_space<vmem>>, vector<1x1x128xf32>
      tpu.vector_store %arg7[%c0_21, %c0_22, %c0_23], %33 {strides = array<i32>} : memref<1x1x128xf32, #tpu.memory_space<vmem>>, vector<1x1x128xf32>,
    } else {
    }
    %c0 = arith.constant 0 : index
    %c0_1 = arith.constant 0 : index
    %3 = vector.load %arg5[%c0, %c0_1] : memref<2x32xf32, #tpu.memory_space<vmem>>, vector<1x32xf32>
    %c1 = arith.constant 1 : index
    %c0_2 = arith.constant 0 : index
    %4 = vector.load %arg5[%c1, %c0_2] : memref<2x32xf32, #tpu.memory_space<vmem>>, vector<1x32xf32>
    %c0_3 = arith.constant 0 : index
    %c0_4 = arith.constant 0 : index
    %5 = vector.load %arg3[%c0_3, %c0_4] : memref<8x32xf32, #tpu.memory_space<vmem>>, vector<8x32xf32>
    %6 = vector.broadcast %3 : vector<1x32xf32> to vector<8x32xf32>
    %7 = arith.mulf %5, %6 : vector<8x32xf32>
    %c0_5 = arith.constant 0 : index
    %c0_6 = arith.constant 0 : index
    %8 = vector.load %arg4[%c0_5, %c0_6] : memref<8x32xf32, #tpu.memory_space<vmem>>, vector<8x32xf32>
    %9 = vector.broadcast %4 : vector<1x32xf32> to vector<8x32xf32>
    %10 = arith.mulf %8, %9 : vector<8x32xf32>
    %11 = arith.addf %7, %10 : vector<8x32xf32>
    %cst = arith.constant dense<0.000000e+00> : vector<8xf32>
    %12 = vector.multi_reduction <add>, %11, %cst [1] : vector<8x32xf32> to vector<8xf32>
    %13 = vector.shape_cast %12 : vector<8xf32> to vector<8x1xf32>
    %14 = tpu.iota {dimensions = array<i32: 1>} : vector<8x128xi32>
    %c0_7 = arith.constant 0 : index
    %c0_8 = arith.constant 0 : index
    %15 = vector.load %arg2[%c0_7, %c0_8] : memref<8x1xi32, #tpu.memory_space<vmem>>, vector<8x1xi32>
    %16 = vector.broadcast %15 : vector<8x1xi32> to vector<8x128xi32>
    %17 = arith.cmpi eq, %14, %16 : vector<8x128xi32>
    %cst_9 = arith.constant 0.000000e+00 : f32
    %18 = vector.shape_cast %13 : vector<8x1xf32> to vector<8x1xf32>
    %19 = vector.broadcast %18 : vector<8x1xf32> to vector<8x128xf32>
    %20 = vector.broadcast %cst_9 : f32 to vector<8x128xf32>
    %21 = arith.select %17, %19, %20 : vector<8x128xi1>, vector<8x128xf32>
    %cst_10 = arith.constant dense<0.000000e+00> : vector<128xf32>
    %22 = vector.multi_reduction <add>, %21, %cst_10 [0] : vector<8x128xf32> to vector<128xf32>
    %23 = vector.shape_cast %22 : vector<128xf32> to vector<1x128xf32>
    %c0_11 = arith.constant 0 : index
    %c0_12 = arith.constant 0 : index
    %c0_13 = arith.constant 0 : index
    %24 = vector.load %arg7[%c0_11, %c0_12, %c0_13] : memref<1x1x128xf32, #tpu.memory_space<vmem>>, vector<1x1x128xf32>
    %25 = vector.shape_cast %23 : vector<1x128xf32> to vector<1x1x128xf32>
    %26 = arith.addf %24, %25 : vector<1x1x128xf32>
    %c0_14 = arith.constant 0 : index
    %c0_15 = arith.constant 0 : index
    %c0_16 = arith.constant 0 : index
    %27 = vector.load %arg7[%c0_14, %c0_15, %c0_16] : memref<1x1x128xf32, #tpu.memory_space<vmem>>, vector<1x1x128xf32>
    tpu.vector_store %arg7[%c0_14, %c0_15, %c0_16], %26 {strides = array<i32>} : memref<1x1x128xf32, #tpu.memory_space<vmem>>, vector<1x1x128xf32>,
    %c0_i32_17 = arith.constant 0 : i32
    %28 = arith.cmpi eq, %arg0, %c0_i32_17 : i32
    %c0_i32_18 = arith.constant 0 : i32
    %29 = arith.cmpi eq, %arg1, %c0_i32_18 : i32
    %30 = arith.andi %28, %29 : i1
    %31 = arith.extui %30 : i1 to i32
    %c0_i32_19 = arith.constant 0 : i32
    %32 = arith.cmpi ne, %31, %c0_i32_19 : i32
    scf.if %32 {
      %c0_20 = arith.constant 0 : index
      %c0_21 = arith.constant 0 : index
      %c0_22 = arith.constant 0 : index
      %33 = vector.load %arg7[%c0_20, %c0_21, %c0_22] : memref<1x1x128xf32, #tpu.memory_space<vmem>>, vector<1x1x128xf32>
      %c0_23 = arith.constant 0 : index
      %c0_24 = arith.constant 0 : index
      %34 = memref.load %arg6[%c0_23, %c0_24] : memref<1x1xf32, #tpu.memory_space<smem>>
      %35 = vector.broadcast %34 : f32 to vector<1x1x128xf32>
      %36 = arith.addf %33, %35 : vector<1x1x128xf32>
      %c0_25 = arith.constant 0 : index
      %c0_26 = arith.constant 0 : index
      %c0_27 = arith.constant 0 : index
      %37 = vector.load %arg7[%c0_25, %c0_26, %c0_27] : memref<1x1x128xf32, #tpu.memory_space<vmem>>, vector<1x1x128xf32>
      tpu.vector_store %arg7[%c0_25, %c0_26, %c0_27], %36 {strides = array<i32>} : memref<1x1x128xf32, #tpu.memory_space<vmem>>, vector<1x1x128xf32>,
    } else {
    }
    return
  }
  func.func @transform_0(%arg0: i32, %arg1: i32) -> (i32, i32) {
    %c1_i32 = arith.constant 1 : i32
    %0 = arith.muli %arg0, %c1_i32 : i32
    %1 = arith.addi %0, %arg1 : i32
    %c0_i32 = arith.constant 0 : i32
    %c0_i32_0 = arith.constant 0 : i32
    return %1, %c0_i32 : i32, i32
  }
  func.func @transform_1(%arg0: i32, %arg1: i32) -> (i32, i32) {
    %c1_i32 = arith.constant 1 : i32
    %0 = arith.muli %arg0, %c1_i32 : i32
    %1 = arith.addi %0, %arg1 : i32
    %c0_i32 = arith.constant 0 : i32
    %c0_i32_0 = arith.constant 0 : i32
    return %1, %c0_i32 : i32, i32
  }
  func.func @transform_2(%arg0: i32, %arg1: i32) -> (i32, i32) {
    %c1_i32 = arith.constant 1 : i32
    %0 = arith.muli %arg0, %c1_i32 : i32
    %1 = arith.addi %0, %arg1 : i32
    %c0_i32 = arith.constant 0 : i32
    %c0_i32_0 = arith.constant 0 : i32
    return %1, %c0_i32 : i32, i32
  }
  func.func @transform_3(%arg0: i32, %arg1: i32) -> (i32, i32) {
    %c0_i32 = arith.constant 0 : i32
    %c0_i32_0 = arith.constant 0 : i32
    %c0_i32_1 = arith.constant 0 : i32
    return %c0_i32, %c0_i32_0 : i32, i32
  }
  func.func @transform_4(%arg0: i32, %arg1: i32) -> (i32, i32) {
    %c0_i32 = arith.constant 0 : i32
    %c0_i32_0 = arith.constant 0 : i32
    %c0_i32_1 = arith.constant 0 : i32
    return %c0_i32, %c0_i32_0 : i32, i32
  }
  func.func @transform_5(%arg0: i32, %arg1: i32) -> (i32, i32, i32) {
    %c0_i32 = arith.constant 0 : i32
    %c0_i32_0 = arith.constant 0 : i32
    %c0_i32_1 = arith.constant 0 : i32
    return %arg0, %c0_i32, %c0_i32_0 : i32, i32, i32
  }
}

</mosaic_0001>

<bundles_post_ra>
// kernel: tpu_custom_call.1
= control target key start
LH: loop header
LB: loop body
LE: loop exit
PB: predicated region body
PF: predicated region fallthrough
CT: control target
= control target key end

     0   :  { %s892_s0 = inlined_call_operand.vmem [shape: s32[16,1], index: 0, kind: input, shape index: {}]   ;;  %s893_s1 = inlined_call_operand.vmem [shape: f32[16,32], index: 1, kind: input, shape index: {}]   ;;  %s894_s2 = inlined_call_operand.hbm [shape: f32[16,32], index: 2, kind: input, shape index: {}]   ;;  %s895_s3 = inlined_call_operand.vmem [shape: f32[2,32], index: 3, kind: input, shape index: {}]   ;;  %s896_s4 = inlined_call_operand.<no memory space> [shape: f32[1,1], index: 4, kind: input, shape index: {}]   ;;  %s897_s5 = inlined_call_operand.hbm [shape: f32[2,1,128], index: 5, kind: output, shape index: {}]  }
   0x1   :  { %10 = sst [smem:[#allocation2]] %s896_s4 }
   0x2   :  { %11 = vsyncpa [#allocation4], 0 }
   0x3   :  { %13 = vsyncpa [#allocation4 + $0x1], 0 }
   0x4   :  { %14 = vsyncpa [#allocation5], 0 }
   0x5   :  { %16 = vsyncpa [#allocation5 + $0x1], 0  ;;  %s700_s20 = smov 0   ;;  %s702_s21 = smov 0  }
   0x6   :  { %s704_s22 = smov 0   ;;  %s706_s23 = smov 0  }
   0x7   :  { %s708_s24 = smov 0   ;;  %s710_s25 = smov 0  }
   0x8 LB: > { %s467_s4 = sadd.s32 4294967295, %s661_s25   ;;  %s468_s26 = sadd.s32 4294967294, %s661_s25   ;;  %s661_s25 = sphi %s710_s25, %s22_s25   ;;  %s657_s24 = sphi %s708_s24, %s913_s24   ;;  %s653_s23 = sphi %s706_s23, %s912_s23   ;;  %s649_s22 = sphi %s704_s22, %s911_s22   ;;  %s645_s21 = sphi %s702_s21, %s910_s21   ;;  %s641_s20 = sphi %s700_s20, %s909_s20  }
   0x9   : > { %s34_s27 = sadd.s32 1, %s657_s24  ;;  %s99_s28 = sadd.s32 1, %s649_s22 }
   0xa   : > { %p36_p0 = scmp.ge.s32.totalorder %s34_s27, 2  ;;  %p106_p1 = scmp.ne.s32.totalorder %s649_s22, %s645_s21 }
   0xb   : > { %p107_p2 = scmp.eq.s32.totalorder %s661_s25, 0  ;;  %p112_p3 = scmp.ne.s32.totalorder %s645_s21, %s641_s20 }
   0xc   : > { %s915_s27 = smov (%p36_p0, %s34_s27), 0  ;;  %p113_p5 = scmp.eq.s32.totalorder %s467_s4, 0 }
   0xd   : > { %p741_p4 = por %p107_p2, %p106_p1  ;;  %s96_s30 = ssub.s32 %s657_s24, %s915_s27 }
   0xe   : > { %p178_p6 = scmp.eq.s32.totalorder %s467_s4, 1  ;;  %p97_p7 = scmp.eq.s32.totalorder %s96_s30, 0 }
   0xf   : > { %p747_p8 = por %p113_p5, %p112_p3  ;;  %p184_p10 = scmp.eq.s32.totalorder %s468_s26, 1 }
  0x10   : > { %p751_p9 = por %p178_p6, %p106_p1  ;;  %p496_p13 = scmp.lt.s32.totalorder %s661_s25, 2 }
  0x11   : > { %s756_s8 = scalar_select %p97_p7, %s649_s22, %s99_s28  }
  0x12   : > { %s901_s7 = scalar_select %p751_p9, 1, 0 }
  0x13   : > { %p758_p11 = por %p184_p10, %p112_p3  ;;  %s228_s10 = sand.u32 1, %s649_s22  }
  0x14   : > { %s471_s11 = sshll.u32 %s228_s10, 3  ;;  %s472_s12 = sshll.u32 %s657_s24, 7 }
  0x15   : > { %s902_s9 = scalar_select %p758_p11, 1, 0 }
  0x16   : > { %s769_s15 = scalar_lea.hbm %s894_s2, %s472_s12  ;;  %s232_s16 = scalar_lea.vmem [#allocation3], %s471_s11 }
  0x17   : > { %s240_s17 = sshll.u32 %s232_s16, 4  ;;  %p775_p0 = pnand %p496_p13, %p741_p4  ;;  %s771_s17 = int_to_ptr.vmem [resolvable:$true] %s240_s17 }
  0x18   : > { %s229_s19 = scalar_lea.sflag [#allocation4], %s228_s10  ;;  %s549_s4 = scalar_lea.hbm %s769_s15, 128 }
  0x19   : > { %p550_p3 = scmp.ne.s32.totalorder %s769_s15, %s549_s4  ;;  %p551_p5 = pneg %p775_p0 }
  0x1a   : > { %s554_s29 = scalar_lea.hbm %s894_s2, 256  ;;  %p555_p4 = scmp.lt.u32.totalorder %s769_s15, %s894_s2 }
  0x1b   : > { %p552_p6 = pnand %p551_p5, %p550_p3  ;;  %p556_p10 = scmp.lt.u32.totalorder %s554_s29, %s549_s4 }
  0x1c   : > { %p558_p12 = scmp.lt.u32.totalorder %s549_s4, %s769_s15 }
  0x1d   : > { %p553_p7 = pneg %p552_p6  ;;  %p557_p13 = por %p556_p10, %p555_p4 }
  0x1f   : > { %p559_p1 = por %p558_p12, %p557_p13 }
  0x21   : > { %p560_p2 = pnand %p559_p1, %p553_p7 }
  0x23   : > { %563 = shalt.err (!%p560_p2)
}
  0x24   : > { %s564_s10 = scalar_lea.vmem %s771_s17, 128  ;;  %s663_s12 = smov [#allocation3]  }
  0x25   : > { %p565_p3 = scmp.ne.s32.totalorder %s771_s17, %s564_s10  ;;  %s569_s13 = sshll.u32 %s663_s12, 4  ;;  %s570_s13 = int_to_ptr.vmem [resolvable:$false] %s569_s13 }
  0x26   : > { %s571_s14 = scalar_lea.vmem %s570_s13, 256  ;;  %p572_p9 = scmp.lt.s32.totalorder %s771_s17, %s570_s13 }
  0x27   : > { %p567_p6 = pnand %p565_p3, %p551_p5  ;;  %p573_p4 = scmp.lt.s32.totalorder %s571_s14, %s564_s10 }
  0x29   : > { %p568_p11 = pneg %p567_p6  ;;  %p574_p10 = por %p573_p4, %p572_p9 }
  0x2b   : > { %p575_p12 = pnand %p574_p10, %p568_p11 }
  0x2d   : > { %578 = shalt.err (!%p575_p12)
}
  0x2e   : > { %491 = dma.hbm_to_vmem [thread:$0]  (!%p775_p0), %s769_s15, 128, %s771_s17, %s229_s19  }
  0x2f   : > { %p904_p1 = scmp.lt.s32.totalorder %s661_s25, 3  ;;  %p905_p2 = scmp.ge.s32.totalorder %s661_s25, 1 }
  0x31   : > { %p246_p5 = pnand %p905_p2, %p904_p1 }
  0x32   : > { %s811_s16 = sand.u32 (!%p246_p5), 1, %s645_s21  }
  0x33   : > { %249 = sbr.rel (%p246_p5) target bundleno = 273 (0x111), region = 40  ;;  %s474_s4 = sshll.u32 (!%p246_p5), %s811_s16, 3 }
  0x34   : > { %s252_s26 = scalar_lea.sflag (!%p246_p5), [#allocation4], %s811_s16  ;;  %s255_s28 = scalar_lea.vmem (!%p246_p5), [#allocation3], %s474_s4 }
  0x3a   : > { %632 = dma.done.wait (%p747_p8), %s252_s26, 128  }
  0x3b   : > { %634 = vsyncadd (%p747_p8), %s252_s26, 4294967168  ;;  %p292_p9 = scmp.lt.s32.totalorder %s653_s23, 1  ;;  %v664_v0 = vmov 0   ;;  %v477_v1 = vld [vmem:[%s895_s3] ss:$0 sm:$0xff]  ;;  %vm324_vm0 = vcmask 261120   ;;  %v328_v11 = vlaneseq }
  0x3c   : > { %548 = vset.pattern.permute.xlu0 %v664_v0  ;;  %v478_v2 = vld [vmem:[%s895_s3 + $0x1] ss:$0 sm:$0xff]  ;;  %s831_s6 = scalar_lea.vmem [#allocation6], %s811_s16  ;;  %v665_v9 = vmov 0.0   ;;  %p345_p8 = scmp.eq.s32.totalorder %s653_s23, 0 }
  0x3d   : > { %s293_s15 = scalar_select %p292_p9, %s653_s23, 1  ;;  %v317_v5 = vld [vmem:[%s255_s28] sm:$0xff]  ;;  %308 = vst [vmem:[%s831_s6] sm:$0x1] %v665_v9  ;;  %v329_v13 = vand.u32 127, %v328_v11 }
  0x3e   : > { %v322_v6 = vmul.f32 %v478_v2, %v317_v5  ;;  %s351_s26 = sld [smem:[#allocation2]] (%p345_p8) }
  0x3f   : > { %s475_s17 = sshll.u32 %s293_s15, 3 }
  0x40   : > { %s301_s29 = scalar_lea.vmem %s893_s1, %s475_s17  ;;  %s295_s4 = scalar_lea.vmem %s892_s0, %s475_s17 }
  0x41   : > { %v311_v3 = vld [vmem:[%s301_s29] sm:$0xff] }
  0x42   : > { %v316_v4 = vmul.f32 %v477_v1, %v311_v3  ;;  %v330_v10 = vld [vmem:[%s295_s4] sm:$0xff] }
  0x44   : > { %v323_v7 = vadd.f32 %v322_v6, %v316_v4  ;;  %v342_v21 = vld [vmem:[%s831_s6] sm:$0x1]  ;;  %v352_v25 = vstv (%p345_p8), %s351_s26 }
  0x46   : > { %v325_v8 = vsel %vm324_vm0, %v323_v7, 0.0 }
  0x47   : > { %326 = vadd.xlane.f32.xlu0 %v325_v8 }
  0x5d   : > { %332 = vperm.xlu0 %548, %v330_v10  }
  0xd4   : > { %v327_v12 = vpop.xlane.xlu0 %326 }
  0xdc   : > { %v333_v14 = vpop.permute.xlu0 %332 }
  0xdd   : > { %vm334_vm1 = vcmp.eq.s32.totalorder %v329_v13, %v333_v14 }
  0xde   : > { %v335_v15 = vsel %vm334_vm1, %v327_v12, 0.0 }
  0xdf   : > { %v336_v16 = vrot.slane %v335_v15, 4 }
  0xe1   : > { %v337_v17 = vadd.f32 %v336_v16, %v335_v15 }
  0xe3   : > { %v338_v18 = vrot.slane %v337_v17, 2 }
  0xe5   : > { %v339_v19 = vadd.f32 %v338_v18, %v337_v17 }
  0xe7   : > { %v340_v20 = vrot.slane %v339_v19, 1  ;;  %349 = sbr.rel (!%p345_p8) target bundleno = 248 (0xf8), region = 52 }
  0xe9   : > { %v341_v22 = vadd.f32 %v340_v20, %v339_v19 }
  0xeb   : > { %v343_v23 = vadd.f32 %v342_v21, %v341_v22 }
  0xed   : > { %344 = vst [vmem:[%s831_s6] sm:$0x1] %v343_v23 }
  0xf4   : > { %v350_v24 = vld [vmem:[%s831_s6] sm:$0x1] }
  0xf5   : > { %v353_v26 = vadd.f32 %v352_v25, %v350_v24 }
  0xf7   : > { %354 = vst [vmem:[%s831_s6] sm:$0x1] %v353_v26 }
  0xf8 PF: > { %s480_s28 = sshll.u32 %s653_s23, 4  ;;  %s368_s19 = sshll.u32 %s831_s6, 4  ;;  %s369_s19 = int_to_ptr.vmem [resolvable:$true] %s368_s19 }
  0xf9   : > { %s848_s18 = scalar_lea.hbm %s897_s5, %s480_s28  ;;  %s356_s29 = scalar_lea.sflag [#allocation5], %s811_s16 }
  0xfa   : > { %s579_s30 = scalar_lea.vmem %s369_s19, 16  ;;  %p906_p0 = scmp.ne.s32.totalorder %s901_s7, 0 }
  0xfb   : > { %p580_p11 = scmp.ne.s32.totalorder %s369_s19, %s579_s30  ;;  %s666_s11 = smov [#allocation6]  }
  0xfc   : > { %s583_s10 = sshll.u32 %s666_s11, 4  ;;  %s584_s10 = int_to_ptr.vmem [resolvable:$false] %s583_s10 }
  0xfd   : > { %p581_p7 = pnand %p580_p11, %p906_p0  ;;  %s585_s12 = scalar_lea.vmem %s584_s10, 32 }
  0xfe   : > { %p586_p3 = scmp.lt.s32.totalorder %s369_s19, %s584_s10  ;;  %p587_p6 = scmp.lt.s32.totalorder %s585_s12, %s579_s30 }
  0xff   : > { %p582_p13 = pneg %p581_p7 }
 0x100   : > { %p588_p4 = por %p587_p6, %p586_p3 }
 0x102   : > { %p589_p10 = pnand %p588_p4, %p582_p13 }
 0x104   : > { %592 = shalt.err (!%p589_p10)
}
 0x105   : > { %s593_s23 = scalar_lea.hbm %s848_s18, 16  ;;  %s597_s13 = scalar_lea.hbm %s897_s5, 32 }
 0x106   : > { %p594_p12 = scmp.ne.s32.totalorder %s848_s18, %s593_s23  ;;  %p598_p5 = scmp.lt.u32.totalorder %s848_s18, %s897_s5 }
 0x107   : > { %p599_p9 = scmp.lt.u32.totalorder %s597_s13, %s593_s23  ;;  %p601_p11 = scmp.lt.u32.totalorder %s593_s23, %s848_s18 }
 0x108   : > { %p595_p1 = pnand %p594_p12, %p906_p0 }
 0x109   : > { %p600_p8 = por %p599_p9, %p598_p5 }
 0x10a   : > { %p596_p2 = pneg %p595_p1 }
 0x10b   : > { %p602_p7 = por %p601_p11, %p600_p8 }
 0x10d   : > { %p603_p13 = pnand %p602_p7, %p596_p2 }
 0x10f   : > { %606 = shalt.err (!%p603_p13)
}
 0x110   : > { %486 = dma.vmem_to_hbm [thread:$0]  (%p906_p0), %s369_s19, 16, %s848_s18, %s356_s29  }
 0x111 PF: > { %s380_s26 = sand.u32 1, %s641_s20   ;;  %p907_p3 = scmp.ne.s32.totalorder %s902_s9, 0 }
 0x112   : > { %p908_p6 = scmp.ge.s32.totalorder %s661_s25, 2  ;;  %s381_s28 = scalar_lea.sflag [#allocation5], %s380_s26 }
 0x114   : > { %p493_p4 = pnand %p908_p6, %p907_p3 }
 0x116   : > { %636 = dma.done.wait (!%p493_p4), %s381_s28, 16  }
 0x117   : > { %638 = vsyncadd (!%p493_p4), %s381_s28, 4294967280  ;;  %s22_s25 = sadd.s32 1, %s661_s25   ;;  %s909_s20 = smov %s645_s21 }
 0x118   : > { %p19_p10 = scmp.ge.s32.totalorder %s22_s25, 4   ;;  %s910_s21 = smov %s649_s22 }
 0x119   : > { %s911_s22 = smov %s756_s8  ;;  %s912_s23 = smov %s657_s24 }
 0x11a   : > { %s913_s24 = smov %s915_s27  ;;  %21 = sbr.rel (!%p19_p10) target bundleno = 8 (0x8), region = 99 }
 0x121   :  { %385 = vsyncpa [#allocation4], 1 }
 0x122   :  { %387 = vsyncpa [#allocation4 + $0x1], 1 }
 0x123   :  { %388 = vsyncpa [#allocation5], 1 }
 0x124   :  { %390 = vsyncpa [#allocation5 + $0x1], 1 }

</bundles_post_ra>
